<compile_context>
chip_gen: v5e
topology: v5e:2x2
jax: 0.10.0
libtpu: 0.0.40
codegen_flags: <defaults>
</compile_context>

<pallas_src>
import functools

import jax
import jax.numpy as jnp
from jax.experimental import pallas as pl
from jax.experimental.pallas import tpu as pltpu


# -----------------------------------------------------------------------------
# Kernel 1: synthetic backbone (1x1 conv + bias + ReLU), M-tiled matmul.
# TODO(synk): real backbone is HRNet-32/48 or CPN (code not provided).
# -----------------------------------------------------------------------------
def _conv1x1_relu_kernel(x_ref, w_ref, b_ref, out_ref):
    x = x_ref[...].astype(jnp.bfloat16)                 # (tm, C) bf16
    y = jnp.dot(x, w_ref[...], preferred_element_type=jnp.float32)
    y = y + b_ref[...]
    out_ref[...] = jnp.maximum(y, 0.0).astype(out_ref.dtype)


def backbone_forward(images_nhwc, w_bf16, b_f32, *, tm=512):
    B, H, W, C = images_nhwc.shape
    F = w_bf16.shape[1]
    M = B * H * W
    x = images_nhwc.reshape(M, C)
    return pl.pallas_call(
        _conv1x1_relu_kernel,
        grid=(pl.cdiv(M, tm),),
        in_specs=[
            pl.BlockSpec((tm, C), lambda i: (i, 0)),
            pl.BlockSpec((C, F), lambda i: (0, 0)),
            pl.BlockSpec((1, F), lambda i: (0, 0)),
        ],
        out_specs=pl.BlockSpec((tm, F), lambda i: (i, 0)),
        out_shape=jax.ShapeDtypeStruct((M, F), jnp.bfloat16),   # bf16 writeback
        compiler_params=pltpu.CompilerParams(
            dimension_semantics=("parallel",),
            vmem_limit_bytes=32 * 1024 * 1024),
    )(x, w_bf16, b_f32)                                  # (B*H*W, F) bf16


# -----------------------------------------------------------------------------
# Kernel 2: fused normalize-crop + bilinear sample + PoseTransformer block,
# gridded over batch.
# TODO(synk): real PoseTransformer (config.model.poseformer) code not provided;
# single-head transformer block stand-in with the same I/O contract.
# -----------------------------------------------------------------------------
def _layernorm(x, g, b, eps=1e-5):
    mu = jnp.mean(x, axis=-1, keepdims=True)
    var = jnp.mean((x - mu) ** 2, axis=-1, keepdims=True)
    return (x - mu) * jax.lax.rsqrt(var + eps) * g + b


def _fused_pose_kernel(kp_ref, crop_ref, feat_ref, wj_ref, wf_ref, pos_ref,
                       wqkv_ref, wo_ref, ln_ref, w1_ref, w2_ref, wh_ref,
                       ball_ref, out_ref, *, H, W, D, HM, J):
    f32 = jnp.float32
    bf16 = jnp.bfloat16

    # --- exact CA_PF.forward crop-keypoint normalization ---------------------
    crop = crop_ref[0]                                   # (Jp, 2) f32
    xs = crop[:, 0:1] / float(192 // 2) - 1.0
    ys = crop[:, 1:2] / float(256 // 2) - 1.0

    # --- bilinear sampling of this batch's backbone features -----------------
    # TODO(synk): the PoseTransformer's internal grid_sample convention is not
    # given; align_corners=True with border clamp is used as the stand-in.
    px = (xs + 1.0) * (0.5 * (W - 1))
    py = (ys + 1.0) * (0.5 * (H - 1))
    x0f = jnp.floor(px)
    y0f = jnp.floor(py)
    wx = px - x0f
    wy = py - y0f
    x0 = jnp.clip(x0f, 0, W - 1).astype(jnp.int32)
    x1 = jnp.clip(x0f + 1.0, 0, W - 1).astype(jnp.int32)
    y0 = jnp.clip(y0f, 0, H - 1).astype(jnp.int32)
    y1 = jnp.clip(y0f + 1.0, 0, H - 1).astype(jnp.int32)

    i00 = y0 * W + x0
    i01 = y0 * W + x1
    i10 = y1 * W + x0
    i11 = y1 * W + x1

    Jp = crop.shape[0]
    HW = feat_ref.shape[1]
    col = jax.lax.broadcasted_iota(jnp.int32, (Jp, HW), 1)
    w00 = (1.0 - wx) * (1.0 - wy)
    w01 = wx * (1.0 - wy)
    w10 = (1.0 - wx) * wy
    w11 = wx * wy
    gmat = ((col == i00).astype(f32) * w00
            + (col == i01).astype(f32) * w01
            + (col == i10).astype(f32) * w10
            + (col == i11).astype(f32) * w11)            # (Jp, H*W)
    feat = feat_ref[0]                                   # (H*W, F) bf16
    sampled = jnp.dot(gmat.astype(bf16), feat, preferred_element_type=f32)

    # --- token embedding ------------------------------------------------------
    kp = kp_ref[0]                                       # (Jp, 2) f32
    x = (jnp.dot(kp, wj_ref[...], preferred_element_type=f32)
         + jnp.dot(sampled.astype(bf16), wf_ref[...], preferred_element_type=f32)
         + pos_ref[...])

    b_all = ball_ref[...]                                # (1, 6D + HM)

    # --- single-head self-attention over this batch's joints -----------------
    # In-kernel mask: padded token columns (>= J) get -1e30 (padded rows are
    # sliced off in the wrapper).
    col_j = jax.lax.broadcasted_iota(jnp.int32, (Jp, Jp), 1)
    amask = jnp.where(col_j < J, 0.0, -1e30).astype(f32)

    qkv = (jnp.dot(x.astype(bf16), wqkv_ref[...], preferred_element_type=f32)
           + b_all[:, 0:3 * D])
    q = qkv[:, 0:D]
    k = qkv[:, D:2 * D]
    v = qkv[:, 2 * D:3 * D]
    scale = 1.0 / (float(D) ** 0.5)
    s = jnp.dot(q.astype(bf16), k.T.astype(bf16),
                preferred_element_type=f32) * scale + amask
    s = s - jnp.max(s, axis=-1, keepdims=True)
    p = jnp.exp(s)
    p = p * pl.reciprocal(jnp.sum(p, axis=-1, keepdims=True), approx=True)
    attn = jnp.dot(p.astype(bf16), v.astype(bf16), preferred_element_type=f32)
    attn = (jnp.dot(attn.astype(bf16), wo_ref[...], preferred_element_type=f32)
            + b_all[:, 3 * D:4 * D])

    g1, be1 = ln_ref[0:1, :], ln_ref[1:2, :]
    g2, be2 = ln_ref[2:3, :], ln_ref[3:4, :]
    x = _layernorm(x + attn, g1, be1)

    # --- MLP ------------------------------------------------------------------
    h = (jnp.dot(x.astype(bf16), w1_ref[...], preferred_element_type=f32)
         + b_all[:, 4 * D:4 * D + HM])
    h = jax.nn.gelu(h, approximate=True)
    h = (jnp.dot(h.astype(bf16), w2_ref[...], preferred_element_type=f32)
         + b_all[:, 4 * D + HM:5 * D + HM])
    x = _layernorm(x + h, g2, be2)

    # --- regression head (lane-dense output; cols >= 3 are zero weights) -----
    out = (jnp.dot(x.astype(bf16), wh_ref[...], preferred_element_type=f32)
           + b_all[:, 5 * D + HM:6 * D + HM])
    out_ref[...] = out[None, :, :]


def fused_pose_forward(kp2d, kp_crop, feat, pf_params, *, H, W, D, HM, J):
    B, Jp, _ = kp2d.shape
    HW = H * W
    F = feat.shape[-1]
    kernel = functools.partial(_fused_pose_kernel, H=H, W=W, D=D, HM=HM, J=J)
    # All poseformer params are 2D, passed untiled (same block each grid step).
    weight_specs = [pl.BlockSpec(tuple(p.shape), lambda b: (0, 0))
                    for p in pf_params]
    out = pl.pallas_call(
        kernel,
        grid=(B,),
        in_specs=[
            pl.BlockSpec((1, Jp, 2), lambda b: (b, 0, 0)),
            pl.BlockSpec((1, Jp, 2), lambda b: (b, 0, 0)),
            pl.BlockSpec((1, HW, F), lambda b: (b, 0, 0)),
        ] + weight_specs,
        out_specs=pl.BlockSpec((1, Jp, D), lambda b: (b, 0, 0)),
        out_shape=jax.ShapeDtypeStruct((B, Jp, D), jnp.float32),
        compiler_params=pltpu.CompilerParams(
            dimension_semantics=("parallel",),          # megacore on v7x
            vmem_limit_bytes=32 * 1024 * 1024),
    )(kp2d, kp_crop, feat, *pf_params)
    return out


# -----------------------------------------------------------------------------
# Deterministic parameter construction + full CA_PF forward
# -----------------------------------------------------------------------------
def init_backbone_params(key, C, F):
    w = (jax.random.normal(key, (C, F), jnp.float32) * 0.1).astype(jnp.bfloat16)
    b = jnp.zeros((1, F), jnp.float32)
    return (w, b)


def init_poseformer_params(key, Jp, F, D, HM):
    ks = jax.random.split(key, 8)
    r = lambda k, s: jax.random.normal(k, s, jnp.float32) * 0.1
    wj = r(ks[0], (2, D))                                 # keypoint embed (f32, K=2)
    wf = r(ks[1], (F, D)).astype(jnp.bfloat16)            # feature embed
    pos = r(ks[2], (Jp, D))                               # positional embed (per joint)
    w_qkv = r(ks[3], (D, 3 * D)).astype(jnp.bfloat16)     # fused QKV
    w_o = r(ks[4], (D, D)).astype(jnp.bfloat16)
    ln = jnp.stack([jnp.ones((D,), jnp.float32), jnp.zeros((D,), jnp.float32),
                    jnp.ones((D,), jnp.float32), jnp.zeros((D,), jnp.float32)])
    w1 = r(ks[5], (D, HM)).astype(jnp.bfloat16)
    w2 = r(ks[6], (HM, D)).astype(jnp.bfloat16)
    wh = jnp.pad(r(ks[7], (D, 3)), ((0, 0), (0, D - 3))).astype(jnp.bfloat16)
    b_all = jnp.zeros((1, 6 * D + HM), jnp.float32)       # [qkv|o|mlp1|mlp2|head]
    return [wj, wf, pos, w_qkv, w_o, ln, w1, w2, wh, b_all]


def ca_pf_forward(images, keypoints_2d_cpn, keypoints_2d_cpn_crop,
                  bb_params, pf_params, *, D, HM, Jp):
    # NCHW permute of the reference forward is layout glue; backbone is NHWC here.
    B, H, W, _ = images.shape
    J = keypoints_2d_cpn.shape[1]

    feat = backbone_forward(images, *bb_params)           # (B*H*W, F) bf16, Pallas
    F = feat.shape[-1]
    feat = feat.reshape(B, H * W, F)                      # streamed per batch

    # Pad token dim to a multiple of 8; padded rows are masked in attention and
    # sliced off below.
    pad = Jp - J
    kp = jnp.pad(keypoints_2d_cpn, ((0, 0), (0, pad), (0, 0)))
    crop = jnp.pad(keypoints_2d_cpn_crop, ((0, 0), (0, pad), (0, 0)))

    out = fused_pose_forward(kp, crop, feat, pf_params,
                             H=H, W=W, D=D, HM=HM, J=J)   # (B, Jp, D)
    return out[:, :J, :3]


if __name__ == "__main__":
    B, H, W, C = 2, 16, 16, 3
    J = 17
    Jp = 24                     # token dim padded to a multiple of 8
    F, D, HM = 128, 128, 256    # lane-dense synthetic widths

    key = jax.random.PRNGKey(0)
    k_img, k_kp, k_crop, k_bb, k_pf = jax.random.split(key, 5)

    images = jax.random.uniform(k_img, (B, H, W, C), jnp.float32)
    keypoints_2d_cpn = jax.random.uniform(k_kp, (B, J, 2), jnp.float32) * 192.0
    keypoints_2d_cpn_crop = (jax.random.uniform(k_crop, (B, J, 2), jnp.float32)
                             * jnp.array([192.0, 256.0], jnp.float32))

    bb_params = init_backbone_params(k_bb, C, F)
    pf_params = init_poseformer_params(k_pf, Jp, F, D, HM)

    keypoints_3d = ca_pf_forward(images, keypoints_2d_cpn, keypoints_2d_cpn_crop,
                                 bb_params, pf_params, D=D, HM=HM, Jp=Jp)
    jax.block_until_ready(keypoints_3d)
    assert keypoints_3d.shape == (B, J, 3)
    assert bool(jnp.all(jnp.isfinite(keypoints_3d)))
    print("KERNEL_OK")
</pallas_src>

<mosaic_0001>
module attributes {stable_mosaic.version = 11 : i64} {
  func.func @_conv1x1_relu_kernel(%arg0: i32, %arg1: memref<512x3xf32, #tpu.memory_space<vmem>>, %arg2: memref<3x128xbf16, #tpu.memory_space<vmem>>, %arg3: memref<1x128xf32, #tpu.memory_space<vmem>>, %arg4: memref<512x128xbf16, #tpu.memory_space<vmem>>) attributes {dimension_semantics = [#tpu.dimension_semantics<parallel>], iteration_bounds = array<i64: 1>, scalar_prefetch = 0 : i64, scratch_operands = 0 : i64, tpu.core_type = #tpu.core_type<tc>, window_params = [{transform_indices = @transform_0, window_bounds = array<i64: 512, 3>}, {pipeline_mode = #tpu.pipeline_mode<synchronous>, transform_indices = @transform_1, window_bounds = array<i64: 3, 128>}, {pipeline_mode = #tpu.pipeline_mode<synchronous>, transform_indices = @transform_2, window_bounds = array<i64: 1, 128>}, {transform_indices = @transform_3, window_bounds = array<i64: 512, 128>}]} {
    %c0 = arith.constant 0 : index
    %c0_0 = arith.constant 0 : index
    %0 = vector.load %arg1[%c0, %c0_0] : memref<512x3xf32, #tpu.memory_space<vmem>>, vector<512x3xf32>
    %1 = arith.truncf %0 : vector<512x3xf32> to vector<512x3xbf16>
    %c0_1 = arith.constant 0 : index
    %c0_2 = arith.constant 0 : index
    %2 = vector.load %arg2[%c0_1, %c0_2] : memref<3x128xbf16, #tpu.memory_space<vmem>>, vector<3x128xbf16>
    %cst = arith.constant dense<0.000000e+00> : vector<512x128xf32>
    %3 = tpu.matmul %1, %2, %cst {dimension_numbers = #tpu.dot_dimension_numbers<[1], [0], [0], [1], [0, 0, 1, 1], [], []>} : vector<512x3xbf16>, vector<3x128xbf16>, vector<512x128xf32> -> vector<512x128xf32>
    %c0_3 = arith.constant 0 : index
    %c0_4 = arith.constant 0 : index
    %4 = vector.load %arg3[%c0_3, %c0_4] : memref<1x128xf32, #tpu.memory_space<vmem>>, vector<1x128xf32>
    %5 = vector.broadcast %4 : vector<1x128xf32> to vector<512x128xf32>
    %6 = arith.addf %3, %5 : vector<512x128xf32>
    %cst_5 = arith.constant 0.000000e+00 : f32
    %7 = vector.broadcast %cst_5 : f32 to vector<512x128xf32>
    %8 = arith.maximumf %6, %7 : vector<512x128xf32>
    %9 = arith.truncf %8 : vector<512x128xf32> to vector<512x128xbf16>
    %c0_6 = arith.constant 0 : index
    %c0_7 = arith.constant 0 : index
    %10 = vector.load %arg4[%c0_6, %c0_7] : memref<512x128xbf16, #tpu.memory_space<vmem>>, vector<512x128xbf16>
    tpu.vector_store %arg4[%c0_6, %c0_7], %9 {strides = array<i32>} : memref<512x128xbf16, #tpu.memory_space<vmem>>, vector<512x128xbf16>,
    return
  }
  func.func @transform_0(%arg0: i32) -> (i32, i32) {
    %c0_i32 = arith.constant 0 : i32
    %c0_i32_0 = arith.constant 0 : i32
    return %arg0, %c0_i32 : i32, i32
  }
  func.func @transform_1(%arg0: i32) -> (i32, i32) {
    %c0_i32 = arith.constant 0 : i32
    %c0_i32_0 = arith.constant 0 : i32
    %c0_i32_1 = arith.constant 0 : i32
    return %c0_i32, %c0_i32_0 : i32, i32
  }
  func.func @transform_2(%arg0: i32) -> (i32, i32) {
    %c0_i32 = arith.constant 0 : i32
    %c0_i32_0 = arith.constant 0 : i32
    %c0_i32_1 = arith.constant 0 : i32
    return %c0_i32, %c0_i32_0 : i32, i32
  }
  func.func @transform_3(%arg0: i32) -> (i32, i32) {
    %c0_i32 = arith.constant 0 : i32
    %c0_i32_0 = arith.constant 0 : i32
    return %arg0, %c0_i32 : i32, i32
  }
}

</mosaic_0001>

<bundles_post_ra>
// kernel: tpu_custom_call.1
= control target key start
LH: loop header
LB: loop body
LE: loop exit
PB: predicated region body
PF: predicated region fallthrough
CT: control target
= control target key end

     0   :  { %vm214_vm0 = vcmask 1040384   ;;  %vm215_vm1 = vcmask 1041408   ;;  %v857_v2 = vmov 65535   ;;  %vm117_vm2 = vcmask 23552   ;;  %s1180_s0 = inlined_call_operand.vmem [shape: f32[512,3], index: 0, kind: input, shape index: {}]   ;;  %s1181_s1 = inlined_call_operand.vmem [shape: bf16[3,128], index: 1, kind: input, shape index: {}]   ;;  %s1182_s2 = inlined_call_operand.vmem [shape: f32[1,128], index: 2, kind: input, shape index: {}]   ;;  %s1183_s3 = inlined_call_operand.hbm [shape: bf16[512,128], index: 3, kind: output, shape index: {}]  }
   0x1   :  { %v112_v0 = vld [vmem:[%s1181_s1] sm:$0x3]  ;;  %v216_v3 = vsel %vm214_vm0, 4294967295, %v857_v2  ;;  %v17_v4 = vld [vmem:[%s1180_s0 + $0x8] sm:$0xff] }
   0x2   :  { %v16_v1 = vld [vmem:[%s1180_s0] sm:$0xff]  ;;  %v33_v6 = vld [vmem:[%s1180_s0 + $0x88] sm:$0xff]  ;;  %v217_v7 = vsel %vm215_vm1, %v216_v3, 0 }
   0x3   :  { %v32_v5 = vld [vmem:[%s1180_s0 + $0x80] sm:$0xff]  ;;  %v49_v9 = vld [vmem:[%s1180_s0 + $0x108] sm:$0xff]  ;;  %v219_v11 = vand.u32 %v217_v7, %v112_v0  ;;  %v80_v13 = vpack.c.bf16 %v17_v4, %v16_v1 }
   0x4   :  { %v48_v8 = vld [vmem:[%s1180_s0 + $0x100] sm:$0xff]  ;;  %v65_v12 = vld [vmem:[%s1180_s0 + $0x188] sm:$0xff]  ;;  %v88_v14 = vpack.c.bf16 %v33_v6, %v32_v5 }
   0x5   :  { %v64_v10 = vld [vmem:[%s1180_s0 + $0x180] sm:$0xff]  ;;  %228 = vmatpush.bf16.msra.mxu0 %v219_v11  ;;  %823 = vmatpush.bf16.msra.mxu1 %v219_v11  ;;  %v96_v15 = vpack.c.bf16 %v49_v9, %v48_v8 }
   0x6   :  { %v104_v16 = vpack.c.bf16 %v65_v12, %v64_v10  ;;  %824 = vmatpush.bf16.msra.mxu2 %v219_v11  ;;  %825 = vmatpush.bf16.msra.mxu3 %v219_v11 }
   0x8   :  { %600 = vmatmul.msk.bf16.vlgmr.msra.gmra.mxu0 %vm117_vm2, %v80_v13  ;;  %608 = vmatmul.msk.bf16.vlgmr.msra.gmra.mxu1 %vm117_vm2, %v88_v14 }
   0x9   :  { %616 = vmatmul.msk.bf16.vlgmr.msra.gmra.mxu2 %vm117_vm2, %v96_v15  ;;  %624 = vmatmul.msk.bf16.vlgmr.msra.gmra.mxu3 %vm117_vm2, %v104_v16 }
   0xa   :  { %8 = vsyncpa [#allocation3], 0  ;;  %v18_v17 = vld [vmem:[%s1180_s0 + $0x10] sm:$0xff]  ;;  %v19_v18 = vld [vmem:[%s1180_s0 + $0x18] sm:$0xff]  ;;  %s588_s6 = sshll.u32 %s1183_s3, 4  ;;  %s859_s7 = smov 64   ;;  %s589_s6 = int_to_ptr.hbm [resolvable:$true] %s588_s6 }
   0xb   :  { %v34_v19 = vld [vmem:[%s1180_s0 + $0x90] sm:$0xff]  ;;  %v35_v20 = vld [vmem:[%s1180_s0 + $0x98] sm:$0xff]  ;;  %v81_v25 = vpack.c.bf16 %v19_v18, %v18_v17  ;;  %v20_v29 = vld [vmem:[%s1180_s0 + $0x20] sm:$0xff]  ;;  %s860_s8 = smov 4  }
   0xc   :  { %v50_v21 = vld [vmem:[%s1180_s0 + $0x110] sm:$0xff]  ;;  %v51_v22 = vld [vmem:[%s1180_s0 + $0x118] sm:$0xff]  ;;  %v89_v26 = vpack.c.bf16 %v35_v20, %v34_v19  ;;  %v21_v30 = vld [vmem:[%s1180_s0 + $0x28] sm:$0xff] }
   0xd   :  { %v66_v23 = vld [vmem:[%s1180_s0 + $0x190] sm:$0xff]  ;;  %v67_v24 = vld [vmem:[%s1180_s0 + $0x198] sm:$0xff]  ;;  %v97_v27 = vpack.c.bf16 %v51_v22, %v50_v21  ;;  %v36_v31 = vld [vmem:[%s1180_s0 + $0xa0] sm:$0xff]  ;;  %v82_v37 = vpack.c.bf16 %v21_v30, %v20_v29 }
   0xe   :  { %v105_v28 = vpack.c.bf16 %v67_v24, %v66_v23  ;;  %v37_v32 = vld [vmem:[%s1180_s0 + $0xa8] sm:$0xff]  ;;  %v52_v33 = vld [vmem:[%s1180_s0 + $0x120] sm:$0xff]  ;;  %v22_v41 = vld [vmem:[%s1180_s0 + $0x30] sm:$0xff] }
   0xf   :  { %v53_v34 = vld [vmem:[%s1180_s0 + $0x128] sm:$0xff]  ;;  %v68_v35 = vld [vmem:[%s1180_s0 + $0x1a0] sm:$0xff]  ;;  %v90_v38 = vpack.c.bf16 %v37_v32, %v36_v31  ;;  %v23_v42 = vld [vmem:[%s1180_s0 + $0x38] sm:$0xff] }
  0x10   :  { %v69_v36 = vld [vmem:[%s1180_s0 + $0x1a8] sm:$0xff]  ;;  %v98_v39 = vpack.c.bf16 %v53_v34, %v52_v33  ;;  %v38_v43 = vld [vmem:[%s1180_s0 + $0xb0] sm:$0xff]  ;;  %v39_v44 = vld [vmem:[%s1180_s0 + $0xb8] sm:$0xff]  ;;  %v83_v49 = vpack.c.bf16 %v23_v42, %v22_v41 }
  0x11   :  { %v106_v40 = vpack.c.bf16 %v69_v36, %v68_v35  ;;  %v54_v45 = vld [vmem:[%s1180_s0 + $0x130] sm:$0xff]  ;;  %v55_v46 = vld [vmem:[%s1180_s0 + $0x138] sm:$0xff]  ;;  %v91_v50 = vpack.c.bf16 %v39_v44, %v38_v43  ;;  %v24_v53 = vld [vmem:[%s1180_s0 + $0x40] sm:$0xff] }
  0x12   :  { %v70_v47 = vld [vmem:[%s1180_s0 + $0x1b0] sm:$0xff]  ;;  %v71_v48 = vld [vmem:[%s1180_s0 + $0x1b8] sm:$0xff]  ;;  %v99_v51 = vpack.c.bf16 %v55_v46, %v54_v45  ;;  %v25_v54 = vld [vmem:[%s1180_s0 + $0x48] sm:$0xff] }
  0x13   :  { %v107_v52 = vpack.c.bf16 %v71_v48, %v70_v47  ;;  %v40_v55 = vld [vmem:[%s1180_s0 + $0xc0] sm:$0xff]  ;;  %v41_v56 = vld [vmem:[%s1180_s0 + $0xc8] sm:$0xff]  ;;  %v84_v61 = vpack.c.bf16 %v25_v54, %v24_v53  ;;  %v26_v1 = vld [vmem:[%s1180_s0 + $0x50] sm:$0xff] }
  0x14   :  { %v56_v57 = vld [vmem:[%s1180_s0 + $0x140] sm:$0xff]  ;;  %v57_v58 = vld [vmem:[%s1180_s0 + $0x148] sm:$0xff]  ;;  %v92_v62 = vpack.c.bf16 %v41_v56, %v40_v55  ;;  %v27_v2 = vld [vmem:[%s1180_s0 + $0x58] sm:$0xff] }
  0x15   :  { %v72_v59 = vld [vmem:[%s1180_s0 + $0x1c0] sm:$0xff]  ;;  %v73_v60 = vld [vmem:[%s1180_s0 + $0x1c8] sm:$0xff]  ;;  %v100_v63 = vpack.c.bf16 %v57_v58, %v56_v57  ;;  %v42_v3 = vld [vmem:[%s1180_s0 + $0xd0] sm:$0xff]  ;;  %v85_v9 = vpack.c.bf16 %v27_v2, %v26_v1 }
  0x16   :  { %v108_v0 = vpack.c.bf16 %v73_v60, %v72_v59  ;;  %v43_v4 = vld [vmem:[%s1180_s0 + $0xd8] sm:$0xff]  ;;  %v58_v5 = vld [vmem:[%s1180_s0 + $0x150] sm:$0xff]  ;;  %v28_v13 = vld [vmem:[%s1180_s0 + $0x60] sm:$0xff] }
  0x17   :  { %v59_v6 = vld [vmem:[%s1180_s0 + $0x158] sm:$0xff]  ;;  %v74_v7 = vld [vmem:[%s1180_s0 + $0x1d0] sm:$0xff]  ;;  %v93_v10 = vpack.c.bf16 %v43_v4, %v42_v3  ;;  %v29_v14 = vld [vmem:[%s1180_s0 + $0x68] sm:$0xff] }
  0x18   :  { %601 = vmatmul.msk.bf16.gmra.mxu0 %vm117_vm2, %v81_v25  ;;  %609 = vmatmul.msk.bf16.gmra.mxu1 %vm117_vm2, %v89_v26  ;;  %v75_v8 = vld [vmem:[%s1180_s0 + $0x1d8] sm:$0xff]  ;;  %v101_v11 = vpack.c.bf16 %v59_v6, %v58_v5  ;;  %v44_v15 = vld [vmem:[%s1180_s0 + $0xe0] sm:$0xff]  ;;  %v45_v16 = vld [vmem:[%s1180_s0 + $0xe8] sm:$0xff]  ;;  %v86_v21 = vpack.c.bf16 %v29_v14, %v28_v13 }
  0x19   :  { %617 = vmatmul.msk.bf16.gmra.mxu2 %vm117_vm2, %v97_v27  ;;  %625 = vmatmul.msk.bf16.gmra.mxu3 %vm117_vm2, %v105_v28  ;;  %v109_v12 = vpack.c.bf16 %v75_v8, %v74_v7  ;;  %v60_v17 = vld [vmem:[%s1180_s0 + $0x160] sm:$0xff]  ;;  %v61_v18 = vld [vmem:[%s1180_s0 + $0x168] sm:$0xff]  ;;  %v94_v22 = vpack.c.bf16 %v45_v16, %v44_v15  ;;  %v30_v25 = vld [vmem:[%s1180_s0 + $0x70] sm:$0xff] }
  0x1a   :  { %v76_v19 = vld [vmem:[%s1180_s0 + $0x1e0] sm:$0xff]  ;;  %v77_v20 = vld [vmem:[%s1180_s0 + $0x1e8] sm:$0xff]  ;;  %v102_v23 = vpack.c.bf16 %v61_v18, %v60_v17  ;;  %v31_v26 = vld [vmem:[%s1180_s0 + $0x78] sm:$0xff] }
  0x1b   :  { %v110_v24 = vpack.c.bf16 %v77_v20, %v76_v19  ;;  %v46_v27 = vld [vmem:[%s1180_s0 + $0xf0] sm:$0xff]  ;;  %v47_v28 = vld [vmem:[%s1180_s0 + $0xf8] sm:$0xff]  ;;  %v87_v33 = vpack.c.bf16 %v31_v26, %v30_v25 }
  0x1c   :  { %v62_v29 = vld [vmem:[%s1180_s0 + $0x170] sm:$0xff]  ;;  %v63_v30 = vld [vmem:[%s1180_s0 + $0x178] sm:$0xff]  ;;  %v95_v34 = vpack.c.bf16 %v47_v28, %v46_v27 }
  0x1d   :  { %v78_v31 = vld [vmem:[%s1180_s0 + $0x1f0] sm:$0xff]  ;;  %v79_v32 = vld [vmem:[%s1180_s0 + $0x1f8] sm:$0xff]  ;;  %v103_v35 = vpack.c.bf16 %v63_v30, %v62_v29  ;;  %s858_s0 = smov [#allocation2]  }
  0x1e   :  { %v111_v36 = vpack.c.bf16 %v79_v32, %v78_v31 }
  0x28   :  { %602 = vmatmul.msk.bf16.gmra.mxu0 %vm117_vm2, %v82_v37  ;;  %610 = vmatmul.msk.bf16.gmra.mxu1 %vm117_vm2, %v90_v38 }
  0x29   :  { %618 = vmatmul.msk.bf16.gmra.mxu2 %vm117_vm2, %v98_v39  ;;  %626 = vmatmul.msk.bf16.gmra.mxu3 %vm117_vm2, %v106_v40  ;;  %v1111_v39 = vld [vmem:[%s1182_s2] ss:$0 sm:$0xff]  ;;  %s586_s2 = sshll.u32 %s858_s0, 4  ;;  %s587_s2 = int_to_ptr.vmem [resolvable:$true] %s586_s2 }
  0x38   :  { %603 = vmatmul.msk.bf16.gmra.mxu0 %vm117_vm2, %v83_v49  ;;  %611 = vmatmul.msk.bf16.gmra.mxu1 %vm117_vm2, %v91_v50 }
  0x39   :  { %619 = vmatmul.msk.bf16.gmra.mxu2 %vm117_vm2, %v99_v51  ;;  %627 = vmatmul.msk.bf16.gmra.mxu3 %vm117_vm2, %v107_v52 }
  0x48   :  { %604 = vmatmul.msk.bf16.gmra.mxu0 %vm117_vm2, %v84_v61  ;;  %612 = vmatmul.msk.bf16.gmra.mxu1 %vm117_vm2, %v92_v62 }
  0x49   :  { %620 = vmatmul.msk.bf16.gmra.mxu2 %vm117_vm2, %v100_v63  ;;  %628 = vmatmul.msk.bf16.gmra.mxu3 %vm117_vm2, %v108_v0 }
  0x58   :  { %605 = vmatmul.msk.bf16.gmra.mxu0 %vm117_vm2, %v85_v9  ;;  %613 = vmatmul.msk.bf16.gmra.mxu1 %vm117_vm2, %v93_v10 }
  0x59   :  { %621 = vmatmul.msk.bf16.gmra.mxu2 %vm117_vm2, %v101_v11  ;;  %629 = vmatmul.msk.bf16.gmra.mxu3 %vm117_vm2, %v109_v12 }
  0x68   :  { %606 = vmatmul.msk.bf16.gmra.mxu0 %vm117_vm2, %v86_v21  ;;  %614 = vmatmul.msk.bf16.gmra.mxu1 %vm117_vm2, %v94_v22 }
  0x69   :  { %622 = vmatmul.msk.bf16.gmra.mxu2 %vm117_vm2, %v102_v23  ;;  %630 = vmatmul.msk.bf16.gmra.mxu3 %vm117_vm2, %v110_v24 }
  0x78   :  { %607 = vmatmul.msk.bf16.gmra.mxu0 %vm117_vm2, %v87_v33  ;;  %615 = vmatmul.msk.bf16.gmra.mxu1 %vm117_vm2, %v95_v34 }
  0x79   :  { %623 = vmatmul.msk.bf16.gmra.mxu2 %vm117_vm2, %v103_v35  ;;  %631 = vmatmul.msk.bf16.gmra.mxu3 %vm117_vm2, %v111_v36 }
  0x85   :  { %v230_v37 = vpop.f32.mrf.mxu0  ;;  %v270_v38 = vpop.f32.mrf.mxu1 }
  0x86   :  { %v231_v40 = vadd.f32 %v1111_v39, %v230_v37  ;;  %v271_v41 = vadd.f32 %v1111_v39, %v270_v38 }
  0x88   :  { %v390_v48 = vmax.f32 %v231_v40, 0.0  ;;  %v406_v49 = vmax.f32 %v271_v41, 0.0 }
  0x8c   :  { %v310_v42 = vpop.f32.mrf.mxu2  ;;  %v350_v43 = vpop.f32.mrf.mxu3 }
  0x8d   :  { %v232_v44 = vpop.f32.mrf.mxu0  ;;  %v272_v45 = vpop.f32.mrf.mxu1  ;;  %v311_v54 = vadd.f32 %v1111_v39, %v310_v42  ;;  %v351_v55 = vadd.f32 %v1111_v39, %v350_v43 }
  0x8e   :  { %v233_v46 = vadd.f32 %v1111_v39, %v232_v44  ;;  %v273_v47 = vadd.f32 %v1111_v39, %v272_v45 }
  0x8f   :  { %v422_v62 = vmax.f32 %v311_v54, 0.0  ;;  %v438_v63 = vmax.f32 %v351_v55, 0.0 }
  0x90   :  { %v391_v50 = vmax.f32 %v233_v46, 0.0  ;;  %v407_v51 = vmax.f32 %v273_v47, 0.0 }
  0x92   :  { %v635_v52 = vpack.c.bf16 %v391_v50, %v390_v48  ;;  %v675_v53 = vpack.c.bf16 %v407_v51, %v406_v49 }
  0x94   :  { %636 = vst [vmem:[#allocation2] sm:$0xff] %v635_v52   ;;  %v312_v56 = vpop.f32.mrf.mxu2  ;;  %v352_v57 = vpop.f32.mrf.mxu3 }
  0x95   :  { %799 = vst [vmem:[#allocation2 + $0x40] sm:$0xff] %v675_v53   ;;  %v313_v58 = vadd.f32 %v1111_v39, %v312_v56  ;;  %v353_v59 = vadd.f32 %v1111_v39, %v352_v57  ;;  %v235_v60 = vpop.f32.mrf.mxu0  ;;  %v275_v61 = vpop.f32.mrf.mxu1 }
  0x96   :  { %v236_v4 = vadd.f32 %v1111_v39, %v235_v60  ;;  %v276_v5 = vadd.f32 %v1111_v39, %v275_v61 }
  0x97   :  { %v423_v0 = vmax.f32 %v313_v58, 0.0  ;;  %v439_v1 = vmax.f32 %v353_v59, 0.0 }
  0x98   :  { %v392_v12 = vmax.f32 %v236_v4, 0.0  ;;  %v408_v13 = vmax.f32 %v276_v5, 0.0 }
  0x99   :  { %v715_v2 = vpack.c.bf16 %v423_v0, %v422_v62  ;;  %v755_v3 = vpack.c.bf16 %v439_v1, %v438_v63 }
  0x9b   :  { %807 = vst [vmem:[#allocation2 + $0x80] sm:$0xff] %v715_v2  }
  0x9c   :  { %815 = vst [vmem:[#allocation2 + $0xc0] sm:$0xff] %v755_v3   ;;  %v315_v6 = vpop.f32.mrf.mxu2  ;;  %v355_v7 = vpop.f32.mrf.mxu3 }
  0x9d   :  { %v237_v8 = vpop.f32.mrf.mxu0  ;;  %v277_v9 = vpop.f32.mrf.mxu1  ;;  %v316_v18 = vadd.f32 %v1111_v39, %v315_v6  ;;  %v356_v19 = vadd.f32 %v1111_v39, %v355_v7 }
  0x9e   :  { %v238_v10 = vadd.f32 %v1111_v39, %v237_v8  ;;  %v278_v11 = vadd.f32 %v1111_v39, %v277_v9 }
  0x9f   :  { %v424_v26 = vmax.f32 %v316_v18, 0.0  ;;  %v440_v27 = vmax.f32 %v356_v19, 0.0 }
  0xa0   :  { %v393_v14 = vmax.f32 %v238_v10, 0.0  ;;  %v409_v15 = vmax.f32 %v278_v11, 0.0 }
  0xa2   :  { %v640_v16 = vpack.c.bf16 %v393_v14, %v392_v12  ;;  %v680_v17 = vpack.c.bf16 %v409_v15, %v408_v13 }
  0xa4   :  { %792 = vst [vmem:[#allocation2 + $0x8] sm:$0xff] %v640_v16   ;;  %v317_v20 = vpop.f32.mrf.mxu2  ;;  %v357_v21 = vpop.f32.mrf.mxu3 }
  0xa5   :  { %800 = vst [vmem:[#allocation2 + $0x48] sm:$0xff] %v680_v17   ;;  %v318_v22 = vadd.f32 %v1111_v39, %v317_v20  ;;  %v358_v23 = vadd.f32 %v1111_v39, %v357_v21  ;;  %v240_v24 = vpop.f32.mrf.mxu0  ;;  %v280_v25 = vpop.f32.mrf.mxu1 }
  0xa6   :  { %v241_v32 = vadd.f32 %v1111_v39, %v240_v24  ;;  %v281_v33 = vadd.f32 %v1111_v39, %v280_v25 }
  0xa7   :  { %v425_v28 = vmax.f32 %v318_v22, 0.0  ;;  %v441_v29 = vmax.f32 %v358_v23, 0.0 }
  0xa8   :  { %v394_v41 = vmax.f32 %v241_v32, 0.0  ;;  %v410_v42 = vmax.f32 %v281_v33, 0.0 }
  0xa9   :  { %v720_v30 = vpack.c.bf16 %v425_v28, %v424_v26  ;;  %v760_v31 = vpack.c.bf16 %v441_v29, %v440_v27 }
  0xab   :  { %808 = vst [vmem:[#allocation2 + $0x88] sm:$0xff] %v720_v30  }
  0xac   :  { %816 = vst [vmem:[#allocation2 + $0xc8] sm:$0xff] %v760_v31   ;;  %v320_v34 = vpop.f32.mrf.mxu2  ;;  %v360_v35 = vpop.f32.mrf.mxu3 }
  0xad   :  { %v242_v36 = vpop.f32.mrf.mxu0  ;;  %v282_v37 = vpop.f32.mrf.mxu1  ;;  %v321_v47 = vadd.f32 %v1111_v39, %v320_v34  ;;  %v361_v48 = vadd.f32 %v1111_v39, %v360_v35 }
  0xae   :  { %v243_v38 = vadd.f32 %v1111_v39, %v242_v36  ;;  %v283_v40 = vadd.f32 %v1111_v39, %v282_v37 }
  0xaf   :  { %v426_v55 = vmax.f32 %v321_v47, 0.0  ;;  %v442_v56 = vmax.f32 %v361_v48, 0.0 }
  0xb0   :  { %v395_v43 = vmax.f32 %v243_v38, 0.0  ;;  %v411_v44 = vmax.f32 %v283_v40, 0.0 }
  0xb2   :  { %v645_v45 = vpack.c.bf16 %v395_v43, %v394_v41  ;;  %v685_v46 = vpack.c.bf16 %v411_v44, %v410_v42 }
  0xb4   :  { %793 = vst [vmem:[#allocation2 + $0x10] sm:$0xff] %v645_v45   ;;  %v322_v49 = vpop.f32.mrf.mxu2  ;;  %v362_v50 = vpop.f32.mrf.mxu3 }
  0xb5   :  { %801 = vst [vmem:[#allocation2 + $0x50] sm:$0xff] %v685_v46   ;;  %v323_v51 = vadd.f32 %v1111_v39, %v322_v49  ;;  %v363_v52 = vadd.f32 %v1111_v39, %v362_v50  ;;  %v245_v53 = vpop.f32.mrf.mxu0  ;;  %v285_v54 = vpop.f32.mrf.mxu1 }
  0xb6   :  { %v246_v61 = vadd.f32 %v1111_v39, %v245_v53  ;;  %v286_v62 = vadd.f32 %v1111_v39, %v285_v54 }
  0xb7   :  { %v427_v57 = vmax.f32 %v323_v51, 0.0  ;;  %v443_v58 = vmax.f32 %v363_v52, 0.0 }
  0xb8   :  { %v396_v5 = vmax.f32 %v246_v61, 0.0  ;;  %v412_v6 = vmax.f32 %v286_v62, 0.0 }
  0xb9   :  { %v725_v59 = vpack.c.bf16 %v427_v57, %v426_v55  ;;  %v765_v60 = vpack.c.bf16 %v443_v58, %v442_v56 }
  0xbb   :  { %809 = vst [vmem:[#allocation2 + $0x90] sm:$0xff] %v725_v59  }
  0xbc   :  { %817 = vst [vmem:[#allocation2 + $0xd0] sm:$0xff] %v765_v60   ;;  %v325_v63 = vpop.f32.mrf.mxu2  ;;  %v365_v0 = vpop.f32.mrf.mxu3 }
  0xbd   :  { %v247_v1 = vpop.f32.mrf.mxu0  ;;  %v287_v2 = vpop.f32.mrf.mxu1  ;;  %v326_v11 = vadd.f32 %v1111_v39, %v325_v63  ;;  %v366_v12 = vadd.f32 %v1111_v39, %v365_v0 }
  0xbe   :  { %v248_v3 = vadd.f32 %v1111_v39, %v247_v1  ;;  %v288_v4 = vadd.f32 %v1111_v39, %v287_v2 }
  0xbf   :  { %v428_v19 = vmax.f32 %v326_v11, 0.0  ;;  %v444_v20 = vmax.f32 %v366_v12, 0.0 }
  0xc0   :  { %v397_v7 = vmax.f32 %v248_v3, 0.0  ;;  %v413_v8 = vmax.f32 %v288_v4, 0.0 }
  0xc2   :  { %v650_v9 = vpack.c.bf16 %v397_v7, %v396_v5  ;;  %v690_v10 = vpack.c.bf16 %v413_v8, %v412_v6 }
  0xc4   :  { %794 = vst [vmem:[#allocation2 + $0x18] sm:$0xff] %v650_v9   ;;  %v327_v13 = vpop.f32.mrf.mxu2  ;;  %v367_v14 = vpop.f32.mrf.mxu3 }
  0xc5   :  { %802 = vst [vmem:[#allocation2 + $0x58] sm:$0xff] %v690_v10   ;;  %v328_v15 = vadd.f32 %v1111_v39, %v327_v13  ;;  %v368_v16 = vadd.f32 %v1111_v39, %v367_v14  ;;  %v250_v17 = vpop.f32.mrf.mxu0  ;;  %v290_v18 = vpop.f32.mrf.mxu1 }
  0xc6   :  { %v251_v25 = vadd.f32 %v1111_v39, %v250_v17  ;;  %v291_v26 = vadd.f32 %v1111_v39, %v290_v18 }
  0xc7   :  { %v429_v21 = vmax.f32 %v328_v15, 0.0  ;;  %v445_v22 = vmax.f32 %v368_v16, 0.0 }
  0xc8   :  { %v398_v33 = vmax.f32 %v251_v25, 0.0  ;;  %v414_v34 = vmax.f32 %v291_v26, 0.0 }
  0xc9   :  { %v730_v23 = vpack.c.bf16 %v429_v21, %v428_v19  ;;  %v770_v24 = vpack.c.bf16 %v445_v22, %v444_v20 }
  0xcb   :  { %810 = vst [vmem:[#allocation2 + $0x98] sm:$0xff] %v730_v23  }
  0xcc   :  { %818 = vst [vmem:[#allocation2 + $0xd8] sm:$0xff] %v770_v24   ;;  %v330_v27 = vpop.f32.mrf.mxu2  ;;  %v370_v28 = vpop.f32.mrf.mxu3 }
  0xcd   :  { %v252_v29 = vpop.f32.mrf.mxu0  ;;  %v292_v30 = vpop.f32.mrf.mxu1  ;;  %v331_v40 = vadd.f32 %v1111_v39, %v330_v27  ;;  %v371_v41 = vadd.f32 %v1111_v39, %v370_v28 }
  0xce   :  { %v253_v31 = vadd.f32 %v1111_v39, %v252_v29  ;;  %v293_v32 = vadd.f32 %v1111_v39, %v292_v30 }
  0xcf   :  { %v430_v48 = vmax.f32 %v331_v40, 0.0  ;;  %v446_v49 = vmax.f32 %v371_v41, 0.0 }
  0xd0   :  { %v399_v35 = vmax.f32 %v253_v31, 0.0  ;;  %v415_v36 = vmax.f32 %v293_v32, 0.0 }
  0xd2   :  { %v655_v37 = vpack.c.bf16 %v399_v35, %v398_v33  ;;  %v695_v38 = vpack.c.bf16 %v415_v36, %v414_v34 }
  0xd4   :  { %795 = vst [vmem:[#allocation2 + $0x20] sm:$0xff] %v655_v37   ;;  %v332_v42 = vpop.f32.mrf.mxu2  ;;  %v372_v43 = vpop.f32.mrf.mxu3 }
  0xd5   :  { %803 = vst [vmem:[#allocation2 + $0x60] sm:$0xff] %v695_v38   ;;  %v333_v44 = vadd.f32 %v1111_v39, %v332_v42  ;;  %v373_v45 = vadd.f32 %v1111_v39, %v372_v43  ;;  %v255_v46 = vpop.f32.mrf.mxu0  ;;  %v295_v47 = vpop.f32.mrf.mxu1 }
  0xd6   :  { %v256_v54 = vadd.f32 %v1111_v39, %v255_v46  ;;  %v296_v55 = vadd.f32 %v1111_v39, %v295_v47 }
  0xd7   :  { %v431_v50 = vmax.f32 %v333_v44, 0.0  ;;  %v447_v51 = vmax.f32 %v373_v45, 0.0 }
  0xd8   :  { %v400_v62 = vmax.f32 %v256_v54, 0.0  ;;  %v416_v63 = vmax.f32 %v296_v55, 0.0 }
  0xd9   :  { %v735_v52 = vpack.c.bf16 %v431_v50, %v430_v48  ;;  %v775_v53 = vpack.c.bf16 %v447_v51, %v446_v49 }
  0xdb   :  { %811 = vst [vmem:[#allocation2 + $0xa0] sm:$0xff] %v735_v52  }
  0xdc   :  { %819 = vst [vmem:[#allocation2 + $0xe0] sm:$0xff] %v775_v53   ;;  %v335_v56 = vpop.f32.mrf.mxu2  ;;  %v375_v57 = vpop.f32.mrf.mxu3 }
  0xdd   :  { %v257_v58 = vpop.f32.mrf.mxu0  ;;  %v297_v59 = vpop.f32.mrf.mxu1  ;;  %v336_v4 = vadd.f32 %v1111_v39, %v335_v56  ;;  %v376_v5 = vadd.f32 %v1111_v39, %v375_v57 }
  0xde   :  { %v258_v60 = vadd.f32 %v1111_v39, %v257_v58  ;;  %v298_v61 = vadd.f32 %v1111_v39, %v297_v59 }
  0xdf   :  { %v432_v12 = vmax.f32 %v336_v4, 0.0  ;;  %v448_v13 = vmax.f32 %v376_v5, 0.0 }
  0xe0   :  { %v401_v0 = vmax.f32 %v258_v60, 0.0  ;;  %v417_v1 = vmax.f32 %v298_v61, 0.0 }
  0xe2   :  { %v660_v2 = vpack.c.bf16 %v401_v0, %v400_v62  ;;  %v700_v3 = vpack.c.bf16 %v417_v1, %v416_v63 }
  0xe4   :  { %796 = vst [vmem:[#allocation2 + $0x28] sm:$0xff] %v660_v2   ;;  %v337_v6 = vpop.f32.mrf.mxu2  ;;  %v377_v7 = vpop.f32.mrf.mxu3 }
  0xe5   :  { %804 = vst [vmem:[#allocation2 + $0x68] sm:$0xff] %v700_v3   ;;  %v338_v8 = vadd.f32 %v1111_v39, %v337_v6  ;;  %v378_v9 = vadd.f32 %v1111_v39, %v377_v7  ;;  %v260_v10 = vpop.f32.mrf.mxu0  ;;  %v300_v11 = vpop.f32.mrf.mxu1 }
  0xe6   :  { %v261_v18 = vadd.f32 %v1111_v39, %v260_v10  ;;  %v301_v19 = vadd.f32 %v1111_v39, %v300_v11 }
  0xe7   :  { %v433_v14 = vmax.f32 %v338_v8, 0.0  ;;  %v449_v15 = vmax.f32 %v378_v9, 0.0 }
  0xe8   :  { %v402_v26 = vmax.f32 %v261_v18, 0.0  ;;  %v418_v27 = vmax.f32 %v301_v19, 0.0 }
  0xe9   :  { %v740_v16 = vpack.c.bf16 %v433_v14, %v432_v12  ;;  %v780_v17 = vpack.c.bf16 %v449_v15, %v448_v13 }
  0xeb   :  { %812 = vst [vmem:[#allocation2 + $0xa8] sm:$0xff] %v740_v16  }
  0xec   :  { %820 = vst [vmem:[#allocation2 + $0xe8] sm:$0xff] %v780_v17   ;;  %v340_v20 = vpop.f32.mrf.mxu2  ;;  %v380_v21 = vpop.f32.mrf.mxu3 }
  0xed   :  { %v262_v22 = vpop.f32.mrf.mxu0  ;;  %v302_v23 = vpop.f32.mrf.mxu1  ;;  %v341_v32 = vadd.f32 %v1111_v39, %v340_v20  ;;  %v381_v33 = vadd.f32 %v1111_v39, %v380_v21 }
  0xee   :  { %v263_v24 = vadd.f32 %v1111_v39, %v262_v22  ;;  %v303_v25 = vadd.f32 %v1111_v39, %v302_v23 }
  0xef   :  { %v434_v41 = vmax.f32 %v341_v32, 0.0  ;;  %v450_v42 = vmax.f32 %v381_v33, 0.0 }
  0xf0   :  { %v403_v28 = vmax.f32 %v263_v24, 0.0  ;;  %v419_v29 = vmax.f32 %v303_v25, 0.0 }
  0xf2   :  { %v665_v30 = vpack.c.bf16 %v403_v28, %v402_v26  ;;  %v705_v31 = vpack.c.bf16 %v419_v29, %v418_v27 }
  0xf4   :  { %797 = vst [vmem:[#allocation2 + $0x30] sm:$0xff] %v665_v30   ;;  %v342_v34 = vpop.f32.mrf.mxu2  ;;  %v382_v35 = vpop.f32.mrf.mxu3 }
  0xf5   :  { %805 = vst [vmem:[#allocation2 + $0x70] sm:$0xff] %v705_v31   ;;  %v343_v36 = vadd.f32 %v1111_v39, %v342_v34  ;;  %v383_v37 = vadd.f32 %v1111_v39, %v382_v35  ;;  %v265_v38 = vpop.f32.mrf.mxu0  ;;  %v305_v40 = vpop.f32.mrf.mxu1 }
  0xf6   :  { %v266_v47 = vadd.f32 %v1111_v39, %v265_v38  ;;  %v306_v48 = vadd.f32 %v1111_v39, %v305_v40 }
  0xf7   :  { %v435_v43 = vmax.f32 %v343_v36, 0.0  ;;  %v451_v44 = vmax.f32 %v383_v37, 0.0 }
  0xf8   :  { %v404_v55 = vmax.f32 %v266_v47, 0.0  ;;  %v420_v56 = vmax.f32 %v306_v48, 0.0 }
  0xf9   :  { %v745_v45 = vpack.c.bf16 %v435_v43, %v434_v41  ;;  %v785_v46 = vpack.c.bf16 %v451_v44, %v450_v42 }
  0xfb   :  { %813 = vst [vmem:[#allocation2 + $0xb0] sm:$0xff] %v745_v45  }
  0xfc   :  { %821 = vst [vmem:[#allocation2 + $0xf0] sm:$0xff] %v785_v46   ;;  %v345_v49 = vpop.f32.mrf.mxu2  ;;  %v385_v50 = vpop.f32.mrf.mxu3 }
  0xfd   :  { %v267_v51 = vpop.f32.mrf.mxu0  ;;  %v307_v52 = vpop.f32.mrf.mxu1  ;;  %v346_v61 = vadd.f32 %v1111_v39, %v345_v49  ;;  %v386_v62 = vadd.f32 %v1111_v39, %v385_v50 }
  0xfe   :  { %v268_v53 = vadd.f32 %v1111_v39, %v267_v51  ;;  %v308_v54 = vadd.f32 %v1111_v39, %v307_v52 }
  0xff   :  { %v436_v3 = vmax.f32 %v346_v61, 0.0  ;;  %v452_v4 = vmax.f32 %v386_v62, 0.0 }
 0x100   :  { %v405_v57 = vmax.f32 %v268_v53, 0.0  ;;  %v421_v58 = vmax.f32 %v308_v54, 0.0 }
 0x102   :  { %v670_v59 = vpack.c.bf16 %v405_v57, %v404_v55  ;;  %v710_v60 = vpack.c.bf16 %v421_v58, %v420_v56 }
 0x104   :  { %798 = vst [vmem:[#allocation2 + $0x38] sm:$0xff] %v670_v59   ;;  %v347_v63 = vpop.f32.mrf.mxu2  ;;  %v387_v0 = vpop.f32.mrf.mxu3 }
 0x105   :  { %806 = vst [vmem:[#allocation2 + $0x78] sm:$0xff] %v710_v60   ;;  %v348_v1 = vadd.f32 %v1111_v39, %v347_v63  ;;  %v388_v2 = vadd.f32 %v1111_v39, %v387_v0 }
 0x107   :  { %v437_v5 = vmax.f32 %v348_v1, 0.0  ;;  %v453_v6 = vmax.f32 %v388_v2, 0.0 }
 0x109   :  { %v750_v7 = vpack.c.bf16 %v437_v5, %v436_v3  ;;  %v790_v8 = vpack.c.bf16 %v453_v6, %v452_v4 }
 0x10b   :  { %814 = vst [vmem:[#allocation2 + $0xb8] sm:$0xff] %v750_v7  }
 0x10c   :  { %822 = vst [vmem:[#allocation2 + $0xf8] sm:$0xff] %v790_v8  }
 0x10d   :  { %594 = dma.vmem_to_hbm [thread:$0]  %s587_s2, 4096, %s589_s6, [#allocation3], %s859_s7, %s859_s7, %s860_s8  }
 0x10e   :  { %855 = dma.done.wait [#allocation3], 4096  }
 0x10f   :  { %856 = vsyncadd [#allocation3], 4294963200 }
 0x110   :  { %599 = vsyncpa [#allocation3], 1 }

</bundles_post_ra>
